<compile_context>
chip_gen: v5e
topology: v5e:2x2
jax: 0.10.0
libtpu: 0.0.40
codegen_flags: <defaults>
</compile_context>

<pallas_src>
import jax
import jax.numpy as jnp
from jax.experimental import pallas as pl
from jax.experimental.pallas import tpu as pltpu


def outconv_kernel(x_ref, w_ref, b_ref, o_ref):
    # x_ref: (Nb*K, THW)   w_ref: (Nb*O, Nb*K)   b_ref: (Nb*O, 1)
    # o_ref: (1, Nb*O, THW)
    out = jnp.dot(w_ref[...], x_ref[...],
                  preferred_element_type=jnp.float32) + b_ref[...]
    o_ref[0] = out.astype(o_ref.dtype)


def _round_up(x, m):
    return ((x + m - 1) // m) * m


# Per-block VMEM budget for the x tile (double-buffered by the pipeline):
# 2 x 4 MiB (x) + 2 x <=0.5 MiB (out) + tiny weights stays under the scoped
# VMEM default of every generation (16 MiB v5e, 32 MiB v6e/v7x) and well under
# v7x's 64 MiB physical VMEM.
_X_BLOCK_BUDGET = 4 << 20
_MAX_LANES = 2048
_MIN_PREF_LANES = 512


def _pick_tiles(N, K, O, HW):
    """Pick (Nb, THW): batch elements per grid step and lane-tile width."""
    divs = [d for d in range(1, min(N, 8) + 1) if N % d == 0]
    # Prefer Nb with sublane-aligned output rows (Nb*O % 8 == 0) -> unmasked vst.
    aligned = [d for d in divs if (d * O) % 8 == 0]
    Nb = max(aligned) if aligned else max(divs)

    hw_pad = _round_up(HW, 128)

    def max_thw(nb):
        cap = (_X_BLOCK_BUDGET // (nb * K * 4)) // 128 * 128
        return max(128, min(_MAX_LANES, hw_pad, cap))

    # If the VMEM budget would force the lane tile below ~512 lanes, shrink Nb
    # first (this also trims the wasted block-diagonal contraction work).
    while max_thw(Nb) < min(_MIN_PREF_LANES, hw_pad) and Nb > 1:
        smaller = [d for d in divs if d < Nb]
        if not smaller:
            break
        Nb = max(smaller)

    THW = max_thw(Nb)

    # v7x has 2 TensorCores: make sure the grid has >= 2 total steps so both
    # parallel axes have work to shard.
    if (N // Nb) * pl.cdiv(HW, THW) < 2:
        if hw_pad >= 256:
            THW = max(128, _round_up(hw_pad // 2, 128))
            while pl.cdiv(HW, THW) < 2 and THW > 128:
                THW -= 128
        elif Nb > 1:
            smaller = [d for d in divs if d < Nb]
            if smaller:
                Nb = max(smaller)
    return Nb, THW


def out_conv(x, w1, b1, w2, b2):
    """x: (N, C, D=8, H, W); returns (N, O, H, W) in x.dtype."""
    N, C, D, H, W = x.shape
    O = w2.shape[0]
    K = C * D          # fused contraction dim; D == 8 => Nb*K is a multiple of 8
    HW = H * W

    # ---- Fuse conv1 + conv2 into one (O, K) weight / (O,) bias (wrapper side).
    w1v = w1.reshape(C).astype(jnp.float32)                      # Conv3d (1,C,1,1,1)
    w2m = w2.reshape(O, D).astype(jnp.float32)                   # Conv2d (O,8,1,1)
    Wf = (w1v[None, :, None] * w2m[:, None, :]).reshape(O, K)    # Wf[o, c*D+d]
    bf = b1.reshape(()) * jnp.sum(w2m, axis=1) + b2.reshape(O)   # (O,)

    Nb, THW = _pick_tiles(N, K, O, HW)
    G = N // Nb
    n_lane = pl.cdiv(HW, THW)

    # Block-diagonal fused weight: one Wf block per batch element in the tile,
    # so a single dense matmul handles Nb batch elements with no transpose.
    # Weights follow x's dtype (bf16 x => bf16 MXU operands); bias stays f32
    # since it adds onto the f32 accumulator.
    Wblk = jnp.kron(jnp.eye(Nb, dtype=jnp.float32), Wf).astype(x.dtype)   # (Nb*O, Nb*K)
    bblk = jnp.tile(bf, Nb).reshape(Nb * O, 1).astype(jnp.float32)        # (Nb*O, 1)

    # Layout-preserving fold only: HW stays on the lane axis, (N, C, D) folds
    # into the row (sublane) axis.
    xr = x.reshape(N * K, HW)

    itemsize = jnp.dtype(x.dtype).itemsize
    cost = pl.CostEstimate(
        flops=2 * N * O * K * HW,
        bytes_accessed=itemsize * (N * K * HW + N * O * HW) + 4 * O * K,
        transcendentals=0,
    )

    out3 = pl.pallas_call(
        outconv_kernel,
        out_shape=jax.ShapeDtypeStruct((G, Nb * O, HW), x.dtype),
        grid_spec=pltpu.PrefetchScalarGridSpec(
            num_scalar_prefetch=0,
            grid=(G, n_lane),
            in_specs=[
                # Nb*K is a multiple of 8 (D == 8); THW is a multiple of 128 and
                # the ragged last lane block (if any) is masked by Pallas.
                pl.BlockSpec((Nb * K, THW), lambda g, h: (g, h)),
                pl.BlockSpec((Nb * O, Nb * K), lambda g, h: (0, 0)),
                pl.BlockSpec((Nb * O, 1), lambda g, h: (0, 0)),
            ],
            # Lane-dense output slab; second-minor block dim equals the full
            # array dim so any O is valid.
            out_specs=pl.BlockSpec((1, Nb * O, THW), lambda g, h: (g, 0, h)),
        ),
        compiler_params=pltpu.CompilerParams(
            dimension_semantics=("parallel", "parallel"),
            vmem_limit_bytes=32 * 1024 * 1024),
        cost_estimate=cost,
    )(xr, Wblk, bblk)

    # (G, Nb*O, HW) -> (N, O, H, W): pure leading-dim reshape, no data movement.
    return out3.reshape(N, O, H, W)


def reference(x, w1, b1, w2, b2):
    # Pure-JAX reference of the two pointwise convs (unfused).
    N, C, D, H, W = x.shape
    O = w2.shape[0]
    y = jnp.einsum('ncdhw,c->ndhw', x, w1.reshape(C)) + b1.reshape(())   # conv1 + squeeze(1)
    out = jnp.einsum('ndhw,od->nohw', y, w2.reshape(O, D)) + b2.reshape(1, O, 1, 1)
    return out


if __name__ == "__main__":
    key = jax.random.PRNGKey(0)
    k_x, k_w1, k_b1, k_w2, k_b2 = jax.random.split(key, 5)

    N, C_in, D, H, W = 2, 4, 8, 16, 16     # D must be 8 (Conv2d expects 8 input channels)
    out_channels = 3

    x = jax.random.normal(k_x, (N, C_in, D, H, W), dtype=jnp.float32)

    # Deterministic parameter init (shapes match nn.Conv3d / nn.Conv2d weights).
    w1 = jax.random.normal(k_w1, (1, C_in, 1, 1, 1), dtype=jnp.float32) * 0.1
    b1 = jax.random.normal(k_b1, (1,), dtype=jnp.float32) * 0.1
    w2 = jax.random.normal(k_w2, (out_channels, 8, 1, 1), dtype=jnp.float32) * 0.1
    b2 = jax.random.normal(k_b2, (out_channels,), dtype=jnp.float32) * 0.1

    out = out_conv(x, w1, b1, w2, b2)
    out = jax.block_until_ready(out)

    ref = reference(x, w1, b1, w2, b2)
    assert out.shape == (N, out_channels, H, W)
    assert jnp.allclose(out, ref, atol=1e-4, rtol=1e-4)

    print("KERNEL_OK")
</pallas_src>

<mosaic_0001>
module attributes {stable_mosaic.version = 11 : i64} {
  func.func @outconv_kernel(%arg0: i32, %arg1: i32, %arg2: memref<64x128xf32, #tpu.memory_space<vmem>>, %arg3: memref<6x64xf32, #tpu.memory_space<vmem>>, %arg4: memref<6x1xf32, #tpu.memory_space<vmem>>, %arg5: memref<1x6x128xf32, #tpu.memory_space<vmem>>) attributes {dimension_semantics = [#tpu.dimension_semantics<parallel>, #tpu.dimension_semantics<parallel>], iteration_bounds = array<i64: 1, 2>, scalar_prefetch = 0 : i64, scratch_operands = 0 : i64, tpu.core_type = #tpu.core_type<tc>, window_params = [{transform_indices = @transform_0, window_bounds = array<i64: 64, 128>}, {pipeline_mode = #tpu.pipeline_mode<synchronous>, transform_indices = @transform_1, window_bounds = array<i64: 6, 64>}, {pipeline_mode = #tpu.pipeline_mode<synchronous>, transform_indices = @transform_2, window_bounds = array<i64: 6, 1>}, {transform_indices = @transform_3, window_bounds = array<i64: 1, 6, 128>}]} {
    %c0 = arith.constant 0 : index
    %c0_0 = arith.constant 0 : index
    %0 = vector.load %arg3[%c0, %c0_0] : memref<6x64xf32, #tpu.memory_space<vmem>>, vector<6x64xf32>
    %c0_1 = arith.constant 0 : index
    %c0_2 = arith.constant 0 : index
    %1 = vector.load %arg2[%c0_1, %c0_2] : memref<64x128xf32, #tpu.memory_space<vmem>>, vector<64x128xf32>
    %cst = arith.constant dense<0.000000e+00> : vector<6x128xf32>
    %2 = tpu.matmul %0, %1, %cst {dimension_numbers = #tpu.dot_dimension_numbers<[1], [0], [0], [1], [0, 0, 1, 1], [], []>} : vector<6x64xf32>, vector<64x128xf32>, vector<6x128xf32> -> vector<6x128xf32>
    %c0_3 = arith.constant 0 : index
    %c0_4 = arith.constant 0 : index
    %3 = vector.load %arg4[%c0_3, %c0_4] : memref<6x1xf32, #tpu.memory_space<vmem>>, vector<6x1xf32>
    %4 = vector.broadcast %3 : vector<6x1xf32> to vector<6x128xf32>
    %5 = arith.addf %2, %4 : vector<6x128xf32>
    %c0_5 = arith.constant 0 : index
    %c0_6 = arith.constant 0 : index
    %c0_7 = arith.constant 0 : index
    %6 = vector.load %arg5[%c0_5, %c0_6, %c0_7] : memref<1x6x128xf32, #tpu.memory_space<vmem>>, vector<1x6x128xf32>
    %7 = vector.shape_cast %6 : vector<1x6x128xf32> to vector<6x128xf32>
    %8 = vector.shape_cast %5 : vector<6x128xf32> to vector<1x6x128xf32>
    tpu.vector_store %arg5[%c0_5, %c0_6, %c0_7], %8 {strides = array<i32>} : memref<1x6x128xf32, #tpu.memory_space<vmem>>, vector<1x6x128xf32>,
    return
  }
  func.func @transform_0(%arg0: i32, %arg1: i32) -> (i32, i32) {
    %c0_i32 = arith.constant 0 : i32
    return %arg0, %arg1 : i32, i32
  }
  func.func @transform_1(%arg0: i32, %arg1: i32) -> (i32, i32) {
    %c0_i32 = arith.constant 0 : i32
    %c0_i32_0 = arith.constant 0 : i32
    %c0_i32_1 = arith.constant 0 : i32
    return %c0_i32, %c0_i32_0 : i32, i32
  }
  func.func @transform_2(%arg0: i32, %arg1: i32) -> (i32, i32) {
    %c0_i32 = arith.constant 0 : i32
    %c0_i32_0 = arith.constant 0 : i32
    %c0_i32_1 = arith.constant 0 : i32
    return %c0_i32, %c0_i32_0 : i32, i32
  }
  func.func @transform_3(%arg0: i32, %arg1: i32) -> (i32, i32, i32) {
    %c0_i32 = arith.constant 0 : i32
    %c0_i32_0 = arith.constant 0 : i32
    return %arg0, %c0_i32, %arg1 : i32, i32, i32
  }
}

</mosaic_0001>

<bundles_post_ra>
// kernel: tpu_custom_call.1
= control target key start
LH: loop header
LB: loop body
LE: loop exit
PB: predicated region body
PF: predicated region fallthrough
CT: control target
= control target key end

     0   :  { %8 = vsyncpa [#allocation3], 0  ;;  %s621_s0 = inlined_call_operand.hbm [shape: f32[64,256], index: 0, kind: input, shape index: {}]   ;;  %s622_s1 = inlined_call_operand.vmem [shape: f32[6,64], index: 1, kind: input, shape index: {}]   ;;  %s623_s2 = inlined_call_operand.vmem [shape: f32[6,1], index: 2, kind: input, shape index: {}]   ;;  %s624_s3 = inlined_call_operand.vmem [shape: f32[1,6,256], index: 3, kind: output, shape index: {}]  }
   0x1   :  { %10 = vsyncpa [#allocation3 + $0x1], 0  ;;  %s527_s12 = smov 0   ;;  %s529_s13 = smov 0  }
   0x2   :  { %s531_s14 = smov 0   ;;  %s533_s15 = smov 0  }
   0x3   :  { %s535_s16 = smov 0   ;;  %s537_s17 = smov 0  }
   0x4 LB: > { %s349_s18 = sadd.s32 4294967295, %s501_s17   ;;  %s25_s19 = sadd.s32 1, %s497_s16  ;;  %s501_s17 = sphi %s537_s17, %s16_s17   ;;  %s497_s16 = sphi %s535_s16, %s631_s16   ;;  %s493_s15 = sphi %s533_s15, %s630_s15   ;;  %s489_s14 = sphi %s531_s14, %s629_s14   ;;  %s485_s13 = sphi %s529_s13, %s628_s13   ;;  %s481_s12 = sphi %s527_s12, %s627_s12  }
   0x5   : > { %p26_p0 = scmp.ge.s32.totalorder %s25_s19, 2  ;;  %s37_s20 = sadd.s32 1, %s489_s14 }
   0x6   : > { %p44_p1 = scmp.ne.s32.totalorder %s489_s14, %s485_s13  ;;  %p45_p2 = scmp.eq.s32.totalorder %s501_s17, 0 }
   0x7   : > { %s633_s19 = smov (%p26_p0, %s25_s19), 0  ;;  %p50_p4 = scmp.ne.s32.totalorder %s485_s13, %s481_s12 }
   0x8   : > { %p563_p3 = por %p45_p2, %p44_p1  ;;  %s33_s22 = ssub.s32 %s497_s16, %s633_s19 }
   0x9   : > { %p51_p5 = scmp.eq.s32.totalorder %s349_s18, 0  ;;  %p35_p6 = scmp.eq.s32.totalorder %s33_s22, 0 }
   0xa   : > { %p367_p8 = scmp.lt.s32.totalorder %s501_s17, 2  ;;  %s150_s25 = sand.u32 1, %s489_s14  }
   0xb   : > { %p570_p7 = por %p51_p5, %p50_p4  ;;  %s354_s26 = sshll.u32 %s497_s16, 3 }
   0xc   : > { %s576_s24 = scalar_select %p35_p6, %s489_s14, %s37_s20  }
   0xd   : > { %s353_s27 = sshll.u32 %s150_s25, 6  ;;  %s161_s30 = scalar_lea.hbm %s621_s0, %s354_s26 }
   0xe   : > { %s162_s4 = sshll.u32 %s161_s30, 4  ;;  %s154_s5 = scalar_lea.vmem [#allocation2], %s353_s27  ;;  %s163_s4 = int_to_ptr.hbm [resolvable:$true] %s162_s4 }
   0xf   : > { %s164_s6 = sshll.u32 %s154_s5, 4  ;;  %p364_p9 = pnand %p367_p8, %p563_p3  ;;  %s165_s6 = int_to_ptr.vmem [resolvable:$true] %s164_s6 }
  0x10   : > { %p355_p10 = scmp.ge.s32.totalorder %s501_s17, 1  ;;  %s151_s7 = scalar_lea.sflag [#allocation3], %s150_s25 }
  0x11   : > { %s503_s8 = smov 256   ;;  %s504_s9 = smov 128  }
  0x12   : > { %s505_s10 = smov 8   ;;  %p172_p11 = scmp.lt.s32.totalorder %s501_s17, 3 }
  0x13   : > { %366 = dma.hbm_to_vmem [thread:$0]  (!%p364_p9), %s163_s4, 1024, %s165_s6, %s151_s7, %s503_s8, %s504_s9, %s505_s10  }
  0x14   : > { %p173_p12 = pnand %p355_p10, %p172_p11 }
  0x15   : > { %s178_s11 = sand.u32 (!%p173_p12), 1, %s485_s13  }
  0x16   : > { %176 = sbr.rel (%p173_p12) target bundleno = 173 (0xad), region = 32  ;;  %s356_s12 = sshll.u32 (!%p173_p12), %s178_s11, 6 }
  0x17   : > { %s179_s18 = scalar_lea.sflag (!%p173_p12), [#allocation3], %s178_s11  ;;  %s182_s20 = scalar_lea.vmem (!%p173_p12), [#allocation2], %s356_s12 }
  0x1b   : > { %476 = dma.done.wait (%p570_p7), %s179_s18, 1024  }
  0x1c   : > { %478 = vsyncadd (%p570_p7), %s179_s18, 4294966272  ;;  %v506_v0 = vmov 0   ;;  %v226_v1 = vld [vmem:[%s182_s20 + $0x38] sm:$0xff]  ;;  %v225_v2 = vld [vmem:[%s182_s20 + $0x30] sm:$0xff]  ;;  %vm233_vm0 = vcmask 523264   ;;  %p212_p13 = scmp.lt.s32.totalorder %s493_s15, 1 }
  0x1d   : > { %420 = vset.pattern.permute.xlu0 %v506_v0  ;;  %245 = vmatpush.msra.mxu0 %v226_v1  ;;  %v224_v3 = vld [vmem:[%s182_s20 + $0x28] sm:$0xff]  ;;  %v227_v4 = vld [vmem:[%s623_s2] sm:$0x3f]  ;;  %v222_v6 = vld [vmem:[%s182_s20 + $0x18] sm:$0xff] }
  0x1e   : > { %v223_v5 = vld [vmem:[%s182_s20 + $0x20] sm:$0xff]  ;;  %230 = vperm.xlu0 %420, %v227_v4   ;;  %v221_v7 = vld [vmem:[%s182_s20 + $0x10] sm:$0xff]  ;;  %v220_v8 = vld [vmem:[%s182_s20 + $0x8] sm:$0xff]  ;;  %s635_s15 = smov (!%p212_p13, %s493_s15), 1 }
  0x1f   : > { %246 = vmatpush.msra.mxu0 %v225_v2  ;;  %v219_v9 = vld [vmem:[%s182_s20] sm:$0xff]  ;;  %s357_s26 = sshll.u32 %s635_s15, 3 }
  0x20   : > { %v218_v10 = vld [vmem:[%s622_s1] sm:$0x3f]  ;;  %s217_s29 = scalar_lea.vmem %s624_s3, %s357_s26 }
  0x21   : > { %247 = vmatpush.msra.mxu0 %v224_v3 }
  0x23   : > { %248 = vmatpush.msra.mxu0 %v223_v5 }
  0x25   : > { %249 = vmatpush.msra.mxu0 %v222_v6 }
  0x27   : > { %250 = vmatpush.msra.mxu0 %v221_v7 }
  0x29   : > { %251 = vmatpush.msra.mxu0 %v220_v8 }
  0x2b   : > { %252 = vmatpush.msra.mxu0 %v219_v9 }
  0x2c   : > { %358 = vmatmul.msk.f32.vlgmr.msra.gmra.mxu0 %vm233_vm0, %v218_v10 }
  0x90   : > { %v231_v11 = vpop.permute.xlu0 %230 }
  0xa9   : > { %v254_v12 = vpop.f32.mrf.mxu0 }
  0xaa   : > { %v255_v13 = vadd.f32 %v254_v12, %v231_v11 }
  0xac   : > { %257 = vst [vmem:[%s217_s29] sm:$0x3f] %v255_v13 }
  0xad PF: > { %s16_s17 = sadd.s32 1, %s501_s17   ;;  %s627_s12 = smov %s485_s13 }
  0xae   : > { %p13_p0 = scmp.ge.s32.totalorder %s16_s17, 4   ;;  %s628_s13 = smov %s489_s14 }
  0xaf   : > { %s629_s14 = smov %s576_s24  ;;  %s630_s15 = smov %s497_s16 }
  0xb0   : > { %s631_s16 = smov %s633_s19  ;;  %15 = sbr.rel (!%p13_p0) target bundleno = 4 (0x4), region = 72 }
  0xb5   :  { %285 = vsyncpa [#allocation3], 1 }
  0xb6   :  { %287 = vsyncpa [#allocation3 + $0x1], 1 }

</bundles_post_ra>
